<compile_context>
chip_gen: v7x
topology: tpu7x:2x2x1
jax: 0.10.0
libtpu: 0.0.40
codegen_flags: <defaults>
</compile_context>

<pallas_src>
import functools

import jax
import jax.numpy as jnp
from jax.experimental import pallas as pl
from jax.experimental.pallas import tpu as pltpu

BN_EPS = 1e-5
_VMEM_LIMIT_BYTES = 40 * 1024 * 1024   # explicit scoped-VMEM ceiling (< v7x 64 MiB)


# --------------------------------------------------------------------------
# Parameter preparation (run ONCE at load time, not per forward call).
# --------------------------------------------------------------------------
def prepare_enhanced_fusion_params(w1, b1, w2, b2, gamma, beta,
                                   compute_dtype=jnp.bfloat16):
    """Fold Linear1 into Linear2, pre-transpose, and cast weights to bf16.

    w1: [C_out, C_in]    (Linear1.weight)     b1: [C_out]
    w2: [C_out, 2*C_out] (Linear2.weight)     b2: [C_out]
    gamma, beta: [C_out] (BatchNorm1d affine)
    """
    w1 = jnp.asarray(w1, jnp.float32)
    b1 = jnp.asarray(b1, jnp.float32)
    w2 = jnp.asarray(w2, jnp.float32)
    b2 = jnp.asarray(b2, jnp.float32)
    c_out, c_in = w1.shape
    assert w2.shape == (c_out, 2 * c_out)

    w2_t = w2.T                       # [2*C_out, C_out]
    w2a = w2_t[:c_out, :]             # multiplies original_features
    w2b = w2_t[c_out:, :]             # multiplies Linear1 output
    wc = w1.T @ w2b                   # [C_in, C_out]   (folded Linear1, f32)
    b_eff = (b1 @ w2b + b2).reshape(1, c_out)

    return dict(
        w2a=w2a.astype(compute_dtype),            # bf16 streamed weight
        wc=wc.astype(compute_dtype),              # bf16 streamed weight
        b_eff=jnp.asarray(b_eff, jnp.float32),    # f32 bias (added post-MXU)
        gamma=jnp.asarray(gamma, jnp.float32).reshape(1, c_out),
        beta=jnp.asarray(beta, jnp.float32).reshape(1, c_out),
    )


# --------------------------------------------------------------------------
# Kernels
# --------------------------------------------------------------------------
def _fused_kernel(orig_ref, trans_ref, w2a_ref, wc_ref, b_ref,
                  gamma_ref, beta_ref, out_ref, *, inv_n):
    """Single-call path: two bf16 dots (f32 acc) + exact centered BN + ReLU."""
    y = (jnp.dot(orig_ref[...], w2a_ref[...],
                 preferred_element_type=jnp.float32)
         + jnp.dot(trans_ref[...], wc_ref[...],
                   preferred_element_type=jnp.float32)
         + b_ref[...])
    mean = jnp.sum(y, axis=0, keepdims=True) * inv_n
    yc = y - mean
    var = jnp.sum(yc * yc, axis=0, keepdims=True) * inv_n
    inv_std = jax.lax.rsqrt(var + BN_EPS)
    out_ref[...] = jnp.maximum(
        yc * inv_std * gamma_ref[...] + beta_ref[...], 0.0
    ).astype(out_ref.dtype)


def _partial_stats_kernel(orig_ref, trans_ref, w2a_ref, wc_ref, b_ref,
                          psum_ref, psumsq_ref, *, n_rows, block_rows):
    """Tiled pass 1: per-block partial sum / sum-of-squares of y (f32).

    Each grid step writes its OWN (1, 8, C) output block, so the grid axis is
    'parallel' (both v7x TensorCores participate).  Rows past the true batch
    size (partial last tile) are masked out of the statistics.
    """
    i = pl.program_id(0)
    y = (jnp.dot(orig_ref[...], w2a_ref[...],
                 preferred_element_type=jnp.float32)
         + jnp.dot(trans_ref[...], wc_ref[...],
                   preferred_element_type=jnp.float32)
         + b_ref[...])

    row = i * block_rows + jax.lax.broadcasted_iota(jnp.int32, y.shape, 0)
    yv = jnp.where(row < n_rows, y, 0.0)

    c = y.shape[1]
    s = jnp.sum(yv, axis=0, keepdims=True)          # (1, C)
    ss = jnp.sum(yv * yv, axis=0, keepdims=True)    # (1, C)
    # Broadcast across 8 sublanes so the output block is (8, C)-tile friendly;
    # the wrapper reads sublane 0 only.
    psum_ref[...] = jnp.broadcast_to(s, (8, c)).reshape(1, 8, c)
    psumsq_ref[...] = jnp.broadcast_to(ss, (8, c)).reshape(1, 8, c)


def _bn_relu_recompute_kernel(orig_ref, trans_ref, w2a_ref, wc_ref,
                              scale_ref, shift_ref, out_ref):
    """Tiled pass 2: recompute the two tiny dots, then pure FMA + ReLU.

    scale/shift already contain gamma*rsqrt(var+eps), beta - mean*scale and
    the folded bias, so there is no per-tile rsqrt/mean work here.
    """
    y = (jnp.dot(orig_ref[...], w2a_ref[...],
                 preferred_element_type=jnp.float32)
         + jnp.dot(trans_ref[...], wc_ref[...],
                   preferred_element_type=jnp.float32))
    out_ref[...] = jnp.maximum(
        y * scale_ref[...] + shift_ref[...], 0.0
    ).astype(out_ref.dtype)


# --------------------------------------------------------------------------
# Wrapper
# --------------------------------------------------------------------------
def enhanced_fusion(original_features, transformed_features, params,
                    *, block_rows=8192):
    """original_features: [N, C_out], transformed_features: [N, C_in]."""
    compute_dtype = params["w2a"].dtype
    orig = original_features.astype(compute_dtype)
    trans = transformed_features.astype(compute_dtype)
    n, c_out = orig.shape
    c_in = trans.shape[1]
    w2a, wc, b_eff = params["w2a"], params["wc"], params["b_eff"]
    gamma, beta = params["gamma"], params["beta"]
    out_dtype = compute_dtype

    if n <= block_rows:
        # ---- single fused call: one dispatch, everything stays in VMEM ----
        vmem = lambda: pl.BlockSpec(memory_space=pltpu.MemorySpace.VMEM)
        return pl.pallas_call(
            functools.partial(_fused_kernel, inv_n=1.0 / n),
            out_shape=jax.ShapeDtypeStruct((n, c_out), out_dtype),
            in_specs=[vmem() for _ in range(7)],
            out_specs=vmem(),
            compiler_params=pltpu.CompilerParams(
                vmem_limit_bytes=_VMEM_LIMIT_BYTES),
        )(orig, trans, w2a, wc, b_eff, gamma, beta)

    # ---- tiled two-pass path: no y HBM round trip, exact global BN stats ----
    n_blocks = pl.cdiv(n, block_rows)

    psum, psumsq = pl.pallas_call(
        functools.partial(_partial_stats_kernel,
                          n_rows=n, block_rows=block_rows),
        out_shape=(jax.ShapeDtypeStruct((n_blocks, 8, c_out), jnp.float32),
                   jax.ShapeDtypeStruct((n_blocks, 8, c_out), jnp.float32)),
        grid=(n_blocks,),
        in_specs=[
            pl.BlockSpec((block_rows, c_out), lambda i: (i, 0)),
            pl.BlockSpec((block_rows, c_in), lambda i: (i, 0)),
            pl.BlockSpec((c_out, c_out), lambda i: (0, 0)),
            pl.BlockSpec((c_in, c_out), lambda i: (0, 0)),
            pl.BlockSpec((1, c_out), lambda i: (0, 0)),
        ],
        out_specs=(
            pl.BlockSpec((1, 8, c_out), lambda i: (i, 0, 0)),
            pl.BlockSpec((1, 8, c_out), lambda i: (i, 0, 0)),
        ),
        compiler_params=pltpu.CompilerParams(
            dimension_semantics=("parallel",),       # megacore on v7x
            vmem_limit_bytes=_VMEM_LIMIT_BYTES),
    )(orig, trans, w2a, wc, b_eff)

    # Tiny (C,)-sized BN finalization, hoisted out of the per-tile pass-2 body.
    inv_n = jnp.float32(1.0 / n)
    total_sum = jnp.sum(psum[:, 0, :], axis=0, keepdims=True)      # (1, C)
    total_sumsq = jnp.sum(psumsq[:, 0, :], axis=0, keepdims=True)  # (1, C)
    mean = total_sum * inv_n
    var = jnp.maximum(total_sumsq * inv_n - mean * mean, 0.0)
    scale = gamma * jax.lax.rsqrt(var + BN_EPS)                    # (1, C) f32
    shift = beta - mean * scale + b_eff * scale   # fold bias + BN shift

    out = pl.pallas_call(
        _bn_relu_recompute_kernel,
        out_shape=jax.ShapeDtypeStruct((n, c_out), out_dtype),
        grid=(n_blocks,),
        in_specs=[
            pl.BlockSpec((block_rows, c_out), lambda i: (i, 0)),
            pl.BlockSpec((block_rows, c_in), lambda i: (i, 0)),
            pl.BlockSpec((c_out, c_out), lambda i: (0, 0)),
            pl.BlockSpec((c_in, c_out), lambda i: (0, 0)),
            pl.BlockSpec((1, c_out), lambda i: (0, 0)),
            pl.BlockSpec((1, c_out), lambda i: (0, 0)),
        ],
        out_specs=pl.BlockSpec((block_rows, c_out), lambda i: (i, 0)),
        compiler_params=pltpu.CompilerParams(
            dimension_semantics=("parallel",),       # megacore on v7x
            vmem_limit_bytes=_VMEM_LIMIT_BYTES),
    )(orig, trans, w2a, wc, scale, shift)
    return out


# --------------------------------------------------------------------------
# Pure-JAX reference mirroring the PyTorch forward (training-mode BN), f32.
# --------------------------------------------------------------------------
def enhanced_fusion_reference(orig, trans, w1, b1, w2, b2, gamma, beta):
    t = trans @ w1.T + b1
    fused = jnp.concatenate([orig, t], axis=1)
    y = fused @ w2.T + b2
    mean = y.mean(axis=0)
    var = ((y - mean) ** 2).mean(axis=0)
    y = (y - mean) / jnp.sqrt(var + BN_EPS) * gamma + beta
    return jnp.maximum(y, 0.0)


if __name__ == "__main__":
    key = jax.random.PRNGKey(0)
    C_IN = 16       # in_channels
    C_OUT = 32      # out_channels
    keys = jax.random.split(key, 8)

    # Deterministic synthetic parameters (shapes follow the module __init__).
    w1 = jax.random.normal(keys[2], (C_OUT, C_IN), dtype=jnp.float32) * 0.1
    b1 = jax.random.normal(keys[3], (C_OUT,), dtype=jnp.float32) * 0.05
    w2 = jax.random.normal(keys[4], (C_OUT, 2 * C_OUT), dtype=jnp.float32) * 0.1
    b2 = jax.random.normal(keys[5], (C_OUT,), dtype=jnp.float32) * 0.05
    gamma = 1.0 + 0.1 * jax.random.normal(keys[6], (C_OUT,), dtype=jnp.float32)
    beta = 0.1 * jax.random.normal(keys[7], (C_OUT,), dtype=jnp.float32)

    # Hoisted, one-time parameter preprocessing (folds Linear1, casts to bf16).
    params = prepare_enhanced_fusion_params(w1, b1, w2, b2, gamma, beta)

    # --- small batch: exercises the single fused-kernel path ---
    N = 64
    orig_bf = jax.random.normal(keys[0], (N, C_OUT),
                                dtype=jnp.float32).astype(jnp.bfloat16)
    trans_bf = jax.random.normal(keys[1], (N, C_IN),
                                 dtype=jnp.float32).astype(jnp.bfloat16)
    out = jax.block_until_ready(enhanced_fusion(orig_bf, trans_bf, params))
    ref = enhanced_fusion_reference(orig_bf.astype(jnp.float32),
                                    trans_bf.astype(jnp.float32),
                                    w1, b1, w2, b2, gamma, beta)
    assert out.shape == (N, C_OUT)
    err = jnp.max(jnp.abs(out.astype(jnp.float32) - ref))
    assert err < 5e-2, f"fused path max abs err {err}"

    # --- larger batch: exercises the tiled two-pass path (partial last tile) ---
    N2 = 400
    orig2 = jax.random.normal(jax.random.PRNGKey(1), (N2, C_OUT),
                              dtype=jnp.float32).astype(jnp.bfloat16)
    trans2 = jax.random.normal(jax.random.PRNGKey(2), (N2, C_IN),
                               dtype=jnp.float32).astype(jnp.bfloat16)
    out2 = jax.block_until_ready(
        enhanced_fusion(orig2, trans2, params, block_rows=128))
    ref2 = enhanced_fusion_reference(orig2.astype(jnp.float32),
                                     trans2.astype(jnp.float32),
                                     w1, b1, w2, b2, gamma, beta)
    assert out2.shape == (N2, C_OUT)
    err2 = jnp.max(jnp.abs(out2.astype(jnp.float32) - ref2))
    assert err2 < 5e-2, f"tiled path max abs err {err2}"

    print("KERNEL_OK")
</pallas_src>

<mosaic_0001>
module attributes {stable_mosaic.version = 11 : i64} {
  func.func @_fused_kernel(%arg0: memref<64x32xbf16, #tpu.memory_space<vmem>>, %arg1: memref<64x16xbf16, #tpu.memory_space<vmem>>, %arg2: memref<32x32xbf16, #tpu.memory_space<vmem>>, %arg3: memref<16x32xbf16, #tpu.memory_space<vmem>>, %arg4: memref<1x32xf32, #tpu.memory_space<vmem>>, %arg5: memref<1x32xf32, #tpu.memory_space<vmem>>, %arg6: memref<1x32xf32, #tpu.memory_space<vmem>>, %arg7: memref<64x32xbf16, #tpu.memory_space<vmem>>) attributes {dimension_semantics = [], scalar_prefetch = 0 : i64, scratch_operands = 0 : i64, tpu.core_type = #tpu.core_type<tc>} {
    %c0 = arith.constant 0 : index
    %c0_0 = arith.constant 0 : index
    %0 = vector.load %arg0[%c0, %c0_0] : memref<64x32xbf16, #tpu.memory_space<vmem>>, vector<64x32xbf16>
    %c0_1 = arith.constant 0 : index
    %c0_2 = arith.constant 0 : index
    %1 = vector.load %arg2[%c0_1, %c0_2] : memref<32x32xbf16, #tpu.memory_space<vmem>>, vector<32x32xbf16>
    %cst = arith.constant dense<0.000000e+00> : vector<64x32xf32>
    %2 = tpu.matmul %0, %1, %cst {dimension_numbers = #tpu.dot_dimension_numbers<[1], [0], [0], [1], [0, 0, 1, 1], [], []>} : vector<64x32xbf16>, vector<32x32xbf16>, vector<64x32xf32> -> vector<64x32xf32>
    %c0_3 = arith.constant 0 : index
    %c0_4 = arith.constant 0 : index
    %3 = vector.load %arg1[%c0_3, %c0_4] : memref<64x16xbf16, #tpu.memory_space<vmem>>, vector<64x16xbf16>
    %c0_5 = arith.constant 0 : index
    %c0_6 = arith.constant 0 : index
    %4 = vector.load %arg3[%c0_5, %c0_6] : memref<16x32xbf16, #tpu.memory_space<vmem>>, vector<16x32xbf16>
    %cst_7 = arith.constant dense<0.000000e+00> : vector<64x32xf32>
    %5 = tpu.matmul %3, %4, %cst_7 {dimension_numbers = #tpu.dot_dimension_numbers<[1], [0], [0], [1], [0, 0, 1, 1], [], []>} : vector<64x16xbf16>, vector<16x32xbf16>, vector<64x32xf32> -> vector<64x32xf32>
    %6 = arith.addf %2, %5 : vector<64x32xf32>
    %c0_8 = arith.constant 0 : index
    %c0_9 = arith.constant 0 : index
    %7 = vector.load %arg4[%c0_8, %c0_9] : memref<1x32xf32, #tpu.memory_space<vmem>>, vector<1x32xf32>
    %8 = vector.broadcast %7 : vector<1x32xf32> to vector<64x32xf32>
    %9 = arith.addf %6, %8 : vector<64x32xf32>
    %cst_10 = arith.constant dense<0.000000e+00> : vector<32xf32>
    %10 = vector.multi_reduction <add>, %9, %cst_10 [0] : vector<64x32xf32> to vector<32xf32>
    %11 = vector.shape_cast %10 : vector<32xf32> to vector<1x32xf32>
    %cst_11 = arith.constant 1.562500e-02 : f32
    %12 = vector.broadcast %cst_11 : f32 to vector<1x32xf32>
    %13 = arith.mulf %11, %12 : vector<1x32xf32>
    %14 = vector.broadcast %13 : vector<1x32xf32> to vector<64x32xf32>
    %15 = arith.subf %9, %14 : vector<64x32xf32>
    %16 = arith.mulf %15, %15 : vector<64x32xf32>
    %cst_12 = arith.constant dense<0.000000e+00> : vector<32xf32>
    %17 = vector.multi_reduction <add>, %16, %cst_12 [0] : vector<64x32xf32> to vector<32xf32>
    %18 = vector.shape_cast %17 : vector<32xf32> to vector<1x32xf32>
    %cst_13 = arith.constant 1.562500e-02 : f32
    %19 = vector.broadcast %cst_13 : f32 to vector<1x32xf32>
    %20 = arith.mulf %18, %19 : vector<1x32xf32>
    %cst_14 = arith.constant 9.99999974E-6 : f32
    %21 = vector.broadcast %cst_14 : f32 to vector<1x32xf32>
    %22 = arith.addf %20, %21 : vector<1x32xf32>
    %23 = math.rsqrt %22 : vector<1x32xf32>
    %24 = vector.broadcast %23 : vector<1x32xf32> to vector<64x32xf32>
    %25 = arith.mulf %15, %24 : vector<64x32xf32>
    %c0_15 = arith.constant 0 : index
    %c0_16 = arith.constant 0 : index
    %26 = vector.load %arg5[%c0_15, %c0_16] : memref<1x32xf32, #tpu.memory_space<vmem>>, vector<1x32xf32>
    %27 = vector.broadcast %26 : vector<1x32xf32> to vector<64x32xf32>
    %28 = arith.mulf %25, %27 : vector<64x32xf32>
    %c0_17 = arith.constant 0 : index
    %c0_18 = arith.constant 0 : index
    %29 = vector.load %arg6[%c0_17, %c0_18] : memref<1x32xf32, #tpu.memory_space<vmem>>, vector<1x32xf32>
    %30 = vector.broadcast %29 : vector<1x32xf32> to vector<64x32xf32>
    %31 = arith.addf %28, %30 : vector<64x32xf32>
    %cst_19 = arith.constant 0.000000e+00 : f32
    %32 = vector.broadcast %cst_19 : f32 to vector<64x32xf32>
    %33 = arith.maximumf %31, %32 : vector<64x32xf32>
    %34 = arith.truncf %33 : vector<64x32xf32> to vector<64x32xbf16>
    %c0_20 = arith.constant 0 : index
    %c0_21 = arith.constant 0 : index
    %35 = vector.load %arg7[%c0_20, %c0_21] : memref<64x32xbf16, #tpu.memory_space<vmem>>, vector<64x32xbf16>
    tpu.vector_store %arg7[%c0_20, %c0_21], %34 {strides = array<i32>} : memref<64x32xbf16, #tpu.memory_space<vmem>>, vector<64x32xbf16>,
    return
  }
}

</mosaic_0001>

<bundles_post_ra>
// kernel: tpu_custom_call.1
= control target key start
LH: loop header
LB: loop body
LE: loop exit
PB: predicated region body
PF: predicated region fallthrough
CT: control target
= control target key end

     0   :  { %vm75_vm0 = vcmask 130048   ;;  %vm185_vm1 = vcmask 261120   ;;  %vm418_vm2 = vcmask 257024   ;;  %s661_s2 = inlined_call_operand.vmem [shape: bf16[32,32], index: 2, kind: input, shape index: {}]   ;;  %s662_s3 = inlined_call_operand.vmem [shape: bf16[16,32], index: 3, kind: input, shape index: {}]   ;;  %s663_s1 = inlined_call_operand.vmem [shape: bf16[64,16], index: 1, kind: input, shape index: {}]   ;;  %s664_s0 = inlined_call_operand.vmem [shape: bf16[64,32], index: 0, kind: input, shape index: {}]   ;;  %s665_s4 = inlined_call_operand.vmem [shape: f32[1,32], index: 4, kind: input, shape index: {}]   ;;  %s666_s5 = inlined_call_operand.vmem [shape: f32[1,32], index: 5, kind: input, shape index: {}]   ;;  %s667_s6 = inlined_call_operand.vmem [shape: f32[1,32], index: 6, kind: input, shape index: {}]   ;;  %s668_s7 = inlined_call_operand.vmem [shape: bf16[64,32], index: 7, kind: output, shape index: {}]  }
   0x1   :  { %v510_v0 = vld [vmem:[%s661_s2] sm:$0xff]   ;;  %v513_v3 = vld [vmem:[%s661_s2 + $0x8] sm:$0xff]   ;;  %v517_v7 = vld [vmem:[%s663_s1 + $0x10] sm:$0xff]  }
   0x2   :  { %v511_v1 = vld [vmem:[%s662_s3] sm:$0xff]   ;;  %490 = vmatprep.subr.bf16.mxu0 %v510_v0  ;;  %v514_v4 = vld [vmem:[%s663_s1 + $0x8] sm:$0xff]   ;;  %v519_v8 = vld [vmem:[%s664_s0 + $0x10] sm:$0xff]  }
   0x3   :  { %v512_v2 = vld [vmem:[%s663_s1] sm:$0xff]   ;;  %480 = vmatprep.subr.bf16.mxu1 %v511_v1  ;;  %491 = vmatpush3.bf16.msra.mxu0 %v510_v0  ;;  %v516_v6 = vld [vmem:[%s664_s0 + $0x8] sm:$0xff]   ;;  %v518_v9 = vld [vmem:[%s663_s1 + $0x18] sm:$0xff]  }
   0x4   :  { %481 = vmatpush3.bf16.msra.mxu1 %v511_v1  ;;  %482 = vmatprep.mubr.msk.bf16.mxu1 %vm75_vm0, %v512_v2  ;;  %v515_v5 = vld [vmem:[%s664_s0] sm:$0xff]   ;;  %v520_v10 = vld [vmem:[%s664_s0 + $0x18] sm:$0xff]  }
   0x5   :  { %492 = vmatprep.subr.bf16.mxu0 %v513_v3  ;;  %494 = vmatprep.mubr.msk.bf16.mxu0 %vm185_vm1, %v515_v5  ;;  %v450_v17 = vld [vmem:[%s665_s4] ss:$0 sm:$0xff] }
   0x7   :  { %483 = vmatmul.mubr.msk.bf16.vlgmr.msra.gmra.mrb[0].mxu1 %vm75_vm0, %v514_v4  ;;  %493 = vmatpush3.bf16.msra.mxu0 %v513_v3 }
   0x8   :  { %486 = vmatprep.mubr.msk.bf16.mxu1 %vm75_vm0, %v517_v7 }
   0xa   :  { %495 = vmatmul.mubr.msk.bf16.vlgmr.msra.gmra.mrb[0].mxu0 %vm185_vm1, %v516_v6 }
   0xb   :  { %498 = vmatprep.mubr.msk.bf16.mxu0 %vm185_vm1, %v519_v8 }
   0xf   :  { %487 = vmatmul.mubr.msk.bf16.gmra.mrb[4].mxu1 %vm75_vm0, %v518_v9 }
  0x12   :  { %499 = vmatmul.mubr.msk.bf16.gmra.mrb[4].mxu0 %vm185_vm1, %v520_v10 }
  0xda   :  { %v484_v11 = vpop.f32.mrb[0].mxu1 }
  0xdb   :  { %v122_v12 = vpop.f32.mrb[1].mxu1 }
  0xdc   :  { %v485_v13 = vpop.f32.mrb[2].mxu1 }
  0xdd   :  { %v125_v14 = vpop.f32.mrb[3].mxu1  ;;  %v496_v15 = vpop.f32.mrb[0].mxu0 }
  0xde   :  { %v241_v16 = vadd.f32 %v496_v15, %v484_v11  ;;  %v232_v18 = vpop.f32.mrb[1].mxu0 }
  0xdf   :  { %v233_v19 = vadd.f32 %v232_v18, %v122_v12  ;;  %v497_v20 = vpop.f32.mrb[2].mxu0 }
  0xe0   :  { %v244_v21 = vadd.f32 %v497_v20, %v485_v13  ;;  %v235_v22 = vpop.f32.mrb[3].mxu0  ;;  %v272_v26 = vadd.f32 %v450_v17, %v241_v16 }
  0xe1   :  { %v270_v23 = vadd.f32 %v450_v17, %v233_v19  ;;  %v236_v24 = vadd.f32 %v235_v22, %v125_v14 }
  0xe2   :  { %v488_v25 = vpop.f32.mrb[4].mxu1  ;;  %v273_v31 = vadd.f32 %v450_v17, %v244_v21  ;;  %v281_v38 = vsel %vm185_vm1, %v272_v26, 0.0 }
  0xe3   :  { %v271_v27 = vadd.f32 %v450_v17, %v236_v24  ;;  %v138_v28 = vpop.f32.mrb[5].mxu1  ;;  %v278_v30 = vsel %vm185_vm1, %v270_v23, 0.0 }
  0xe4   :  { %v489_v29 = vpop.f32.mrb[6].mxu1  ;;  %v283_v44 = vsel %vm185_vm1, %v273_v31, 0.0 }
  0xe5   :  { %v279_v32 = vsel %vm185_vm1, %v271_v27, 0.0  ;;  %v141_v33 = vpop.f32.mrb[7].mxu1  ;;  %v500_v34 = vpop.f32.mrb[4].mxu0 }
  0xe6   :  { %v280_v35 = vadd.f32 %v279_v32, %v278_v30  ;;  %v257_v36 = vadd.f32 %v500_v34, %v488_v25  ;;  %v248_v37 = vpop.f32.mrb[5].mxu0 }
  0xe7   :  { %v249_v39 = vadd.f32 %v248_v37, %v138_v28  ;;  %v501_v40 = vpop.f32.mrb[6].mxu0 }
  0xe8   :  { %v282_v41 = vadd.f32 %v281_v38, %v280_v35  ;;  %v260_v42 = vadd.f32 %v501_v40, %v489_v29  ;;  %v251_v43 = vpop.f32.mrb[7].mxu0  ;;  %v276_v48 = vadd.f32 %v450_v17, %v257_v36 }
  0xe9   :  { %v274_v45 = vadd.f32 %v450_v17, %v249_v39  ;;  %v252_v46 = vadd.f32 %v251_v43, %v141_v33 }
  0xea   :  { %v284_v47 = vadd.f32 %v283_v44, %v282_v41  ;;  %v277_v52 = vadd.f32 %v450_v17, %v260_v42  ;;  %v289_v55 = vsel %vm185_vm1, %v276_v48, 0.0  ;;  %v451_v42 = vld [vmem:[%s666_s5] ss:$0 sm:$0xff] }
  0xeb   :  { %v285_v49 = vsel %vm185_vm1, %v274_v45, 0.0  ;;  %v275_v50 = vadd.f32 %v450_v17, %v252_v46 }
  0xec   :  { %v286_v51 = vadd.f32 %v285_v49, %v284_v47  ;;  %v291_v57 = vsel %vm185_vm1, %v277_v52, 0.0 }
  0xed   :  { %v287_v53 = vsel %vm185_vm1, %v275_v50, 0.0 }
  0xee   :  { %v288_v54 = vadd.f32 %v287_v53, %v286_v51  ;;  %v452_v51 = vld [vmem:[%s667_s6] ss:$0 sm:$0xff] }
  0xf0   :  { %v290_v56 = vadd.f32 %v289_v55, %v288_v54 }
  0xf2   :  { %v292_v58 = vadd.f32 %v291_v57, %v290_v56 }
  0xf4   :  { %v293_v59 = vrot.slane %v292_v58, 4 }
  0xf6   :  { %v294_v60 = vadd.f32 %v293_v59, %v292_v58 }
  0xf8   :  { %v295_v61 = vrot.slane %v294_v60, 2 }
  0xfa   :  { %v296_v62 = vadd.f32 %v295_v61, %v294_v60 }
  0xfc   :  { %v297_v63 = vrot.slane %v296_v62, 1 }
  0xfe   :  { %v298_v0 = vadd.f32 %v297_v63, %v296_v62 }
 0x100   :  { %v299_v1 = vmul.f32 0.015625, %v298_v0 }
 0x102   :  { %v300_v2 = vsub.f32 %v270_v23, %v299_v1  ;;  %v301_v3 = vsub.f32 %v271_v27, %v299_v1  ;;  %v302_v4 = vsub.f32 %v272_v26, %v299_v1  ;;  %v303_v5 = vsub.f32 %v273_v31, %v299_v1 }
 0x103   :  { %v304_v6 = vsub.f32 %v274_v45, %v299_v1  ;;  %v305_v7 = vsub.f32 %v275_v50, %v299_v1  ;;  %v306_v8 = vsub.f32 %v276_v48, %v299_v1  ;;  %v307_v9 = vsub.f32 %v277_v52, %v299_v1 }
 0x104   :  { %v308_v10 = vmul.f32 %v300_v2, %v300_v2  ;;  %v309_v11 = vmul.f32 %v301_v3, %v301_v3  ;;  %v310_v12 = vmul.f32 %v302_v4, %v302_v4  ;;  %v311_v13 = vmul.f32 %v303_v5, %v303_v5 }
 0x105   :  { %v312_v17 = vmul.f32 %v304_v6, %v304_v6  ;;  %v313_v20 = vmul.f32 %v305_v7, %v305_v7  ;;  %v314_v23 = vmul.f32 %v306_v8, %v306_v8  ;;  %v315_v26 = vmul.f32 %v307_v9, %v307_v9 }
 0x106   :  { %v316_v14 = vsel %vm185_vm1, %v308_v10, 0.0  ;;  %v317_v15 = vsel %vm185_vm1, %v309_v11, 0.0  ;;  %v319_v18 = vsel %vm185_vm1, %v310_v12, 0.0  ;;  %v321_v21 = vsel %vm185_vm1, %v311_v13, 0.0 }
 0x107   :  { %v318_v16 = vadd.f32 %v317_v15, %v316_v14  ;;  %v323_v24 = vsel %vm185_vm1, %v312_v17, 0.0  ;;  %v325_v27 = vsel %vm185_vm1, %v313_v20, 0.0  ;;  %v327_v29 = vsel %vm185_vm1, %v314_v23, 0.0 }
 0x108   :  { %v329_v31 = vsel %vm185_vm1, %v315_v26, 0.0 }
 0x109   :  { %v320_v19 = vadd.f32 %v319_v18, %v318_v16 }
 0x10b   :  { %v322_v22 = vadd.f32 %v321_v21, %v320_v19 }
 0x10d   :  { %v324_v25 = vadd.f32 %v323_v24, %v322_v22 }
 0x10f   :  { %v326_v28 = vadd.f32 %v325_v27, %v324_v25 }
 0x111   :  { %v328_v30 = vadd.f32 %v327_v29, %v326_v28 }
 0x113   :  { %v330_v32 = vadd.f32 %v329_v31, %v328_v30 }
 0x115   :  { %v331_v33 = vrot.slane %v330_v32, 4 }
 0x117   :  { %v332_v34 = vadd.f32 %v331_v33, %v330_v32 }
 0x119   :  { %v333_v35 = vrot.slane %v332_v34, 2 }
 0x11b   :  { %v334_v36 = vadd.f32 %v333_v35, %v332_v34 }
 0x11d   :  { %v335_v37 = vrot.slane %v334_v36, 1 }
 0x11f   :  { %v336_v38 = vadd.f32 %v335_v37, %v334_v36 }
 0x121   :  { %v337_v39 = vmul.f32 0.015625, %v336_v38 }
 0x123   :  { %v338_v40 = vadd.f32 1e-05, %v337_v39 }
 0x125   :  { %521 = vrsqrt.f32 %v338_v40 }
 0x12f   :  { %v522_v41 = vpop.eup %521 }
 0x130   :  { %v340_v43 = vmul.f32 %v522_v41, %v300_v2  ;;  %v341_v44 = vmul.f32 %v522_v41, %v301_v3  ;;  %v342_v45 = vmul.f32 %v522_v41, %v302_v4  ;;  %v343_v46 = vmul.f32 %v522_v41, %v303_v5 }
 0x131   :  { %v344_v47 = vmul.f32 %v522_v41, %v304_v6  ;;  %v345_v48 = vmul.f32 %v522_v41, %v305_v7  ;;  %v346_v49 = vmul.f32 %v522_v41, %v306_v8  ;;  %v347_v50 = vmul.f32 %v522_v41, %v307_v9 }
 0x132   :  { %v355_v52 = vmul.f32 %v451_v42, %v340_v43  ;;  %v356_v53 = vmul.f32 %v451_v42, %v341_v44  ;;  %v357_v54 = vmul.f32 %v451_v42, %v342_v45  ;;  %v358_v55 = vmul.f32 %v451_v42, %v343_v46 }
 0x133   :  { %v359_v56 = vmul.f32 %v451_v42, %v344_v47  ;;  %v360_v57 = vmul.f32 %v451_v42, %v345_v48  ;;  %v361_v58 = vmul.f32 %v451_v42, %v346_v49  ;;  %v362_v59 = vmul.f32 %v451_v42, %v347_v50 }
 0x134   :  { %v370_v60 = vadd.f32 %v452_v51, %v355_v52  ;;  %v371_v61 = vadd.f32 %v452_v51, %v356_v53  ;;  %v372_v62 = vadd.f32 %v452_v51, %v357_v54  ;;  %v373_v63 = vadd.f32 %v452_v51, %v358_v55 }
 0x135   :  { %v374_v0 = vadd.f32 %v452_v51, %v359_v56  ;;  %v375_v1 = vadd.f32 %v452_v51, %v360_v57  ;;  %v376_v2 = vadd.f32 %v452_v51, %v361_v58  ;;  %v377_v3 = vadd.f32 %v452_v51, %v362_v59 }
 0x136   :  { %v378_v4 = vmax.f32 %v370_v60, 0.0  ;;  %v379_v5 = vmax.f32 %v371_v61, 0.0  ;;  %v380_v6 = vmax.f32 %v372_v62, 0.0  ;;  %v381_v7 = vmax.f32 %v373_v63, 0.0 }
 0x137   :  { %v382_v8 = vmax.f32 %v374_v0, 0.0  ;;  %v383_v9 = vmax.f32 %v375_v1, 0.0  ;;  %v384_v10 = vmax.f32 %v376_v2, 0.0  ;;  %v385_v11 = vmax.f32 %v377_v3, 0.0 }
 0x138   :  { %v461_v12 = vpack.c.bf16 %v378_v4, %v378_v4  ;;  %v462_v13 = vpack.c.bf16 %v379_v5, %v379_v5  ;;  %v463_v14 = vpack.c.bf16 %v380_v6, %v380_v6  ;;  %v464_v15 = vpack.c.bf16 %v381_v7, %v381_v7 }
 0x139   :  { %v465_v16 = vpack.c.bf16 %v382_v8, %v382_v8  ;;  %v466_v17 = vpack.c.bf16 %v383_v9, %v383_v9  ;;  %v467_v18 = vpack.c.bf16 %v384_v10, %v384_v10  ;;  %v468_v19 = vpack.c.bf16 %v385_v11, %v385_v11 }
 0x13a   :  { %419 = vst.msk [vmem:[%s668_s7] sm:$0xf] %vm418_vm2, %v461_v12  ;;  %420 = vst.msk [vmem:[%s668_s7 + $0x4] sm:$0xf] %vm418_vm2, %v462_v13 }
 0x13b   :  { %421 = vst.msk [vmem:[%s668_s7 + $0x8] sm:$0xf] %vm418_vm2, %v463_v14  ;;  %422 = vst.msk [vmem:[%s668_s7 + $0xc] sm:$0xf] %vm418_vm2, %v464_v15 }
 0x13c   :  { %423 = vst.msk [vmem:[%s668_s7 + $0x10] sm:$0xf] %vm418_vm2, %v465_v16  ;;  %424 = vst.msk [vmem:[%s668_s7 + $0x14] sm:$0xf] %vm418_vm2, %v466_v17 }
 0x13d   :  { %425 = vst.msk [vmem:[%s668_s7 + $0x18] sm:$0xf] %vm418_vm2, %v467_v18  ;;  %426 = vst.msk [vmem:[%s668_s7 + $0x1c] sm:$0xf] %vm418_vm2, %v468_v19 }

</bundles_post_ra>
